<compile_context>
chip_gen: v7x
topology: tpu7x:2x2x1
jax: 0.10.0
libtpu: 0.0.40
codegen_flags: <defaults>
</compile_context>

<pallas_src>
import functools

import jax
import jax.numpy as jnp
from jax.experimental import pallas as pl
from jax.experimental.pallas import tpu as pltpu


def _choose_row_tile(OH, OW_pad):
    """~512 flat output rows per grid step, preferring a divisor of OH (no padded rows)."""
    target = max(1, 512 // OW_pad)
    toh = min(OH, target)
    for cand in range(toh, 0, -1):
        if OH % cand == 0:
            return cand
    return 1


def _conv_stats_kernel(xf_ref, w_ref, o_ref, st_ref, *, KH, stride, HQ, TOH, OH):
    # xf_ref: (1, stride*HQ, OW_pad, KW*C) bf16  -- kw/c folded into lanes, h split by
    #                                               stride phase: row phase*HQ + h//stride
    # w_ref:  (KH*KW*C, OCp)               bf16  -- grid-invariant, single-buffered
    # o_ref:  (1, TOH, OW_pad, OCp)        bf16  -- conv output tile (lane-dense)
    # st_ref: (1, 1, 2, OCp)               f32   -- row 0: sum, row 1: sum of squares
    r = pl.program_id(1)
    KWC = xf_ref.shape[-1]
    _, _, OW_pad, OCp = o_ref.shape
    rows = TOH * OW_pad

    # Stage the KH taps (im2col-in-VMEM): each tap is a contiguous, aligned row window
    # of the phase-reorganized activation; lane-concatenate to a single deep-K operand.
    slabs = []
    for kh in range(KH):
        start = (kh % stride) * HQ + r * TOH + (kh // stride)
        slab = xf_ref[0, pl.ds(start, TOH), :, :]          # (TOH, OW_pad, KWC) bf16
        slabs.append(slab.reshape(rows, KWC))              # free reshape (OW_pad % 8 == 0)
    lhs = jnp.concatenate(slabs, axis=-1)                  # (rows, KH*KW*C)

    # One MXU matmul with K = KH*KW*C, f32 accumulation.
    acc = jnp.dot(lhs, w_ref[...], preferred_element_type=jnp.float32)   # (rows, OCp)

    acc3 = acc.reshape(TOH, OW_pad, OCp)
    if OH % TOH != 0:
        # Only the last row tile can contain out-of-range output rows; zero them so they
        # do not pollute the BN statistics (simple compare, no div/mod in the kernel).
        toh = jax.lax.broadcasted_iota(jnp.int32, (TOH, OW_pad, 1), 0)
        acc3 = jnp.where(r * TOH + toh < OH, acc3, 0.0)
        acc = acc3.reshape(rows, OCp)

    o_ref[0] = acc3.astype(o_ref.dtype)                    # bf16 writeback

    # Fused BN batch statistics. Padded ow columns have all-zero patches -> contribute 0.
    # TODO(synk): E[x^2]-E[x]^2 can cancel for large-mean channels; switch to a two-pass
    # variance if BN-stat precision at very large N*OH*OW ever matters.
    st_ref[0, 0, 0:1, :] = jnp.sum(acc, axis=0, keepdims=True)
    st_ref[0, 0, 1:2, :] = jnp.sum(acc * acc, axis=0, keepdims=True)


def _bn_act_kernel(x_ref, scale_ref, bias_ref, o_ref, *, relu, lrelu, OW, OC):
    # x_ref: (1, TOH, OW_pad, OCp) bf16, scale/bias: (1, 1, OCp) f32 (broadcast),
    # o_ref: (1, TOH, OW, OC) f32 -- compact NHWC tile (crop done here, not in XLA).
    y = x_ref[0].astype(jnp.float32) * scale_ref[...] + bias_ref[...]
    if relu:
        y = jnp.maximum(y, 0.0)
    if lrelu:
        y = jnp.where(y >= 0.0, y, 0.1 * y)   # module uses negative_slope=0.1
    o_ref[0] = y[:, :OW, :OC]


def conv2d_unit(x, weight, gamma, beta, *, stride=1, relu=True, lrelu=False, eps=1e-5):
    """Forward of Conv2dUnit (bn=True path: conv has no bias; BN uses batch stats)."""
    N, C, H, W = x.shape
    OC, C2, KH, KW = weight.shape
    assert C2 == C
    s = int(stride)
    OH = (H - KH) // s + 1
    OW = (W - KW) // s + 1
    assert OH > 0 and OW > 0

    OCp = pl.cdiv(OC, 128) * 128          # lane-dense output channels
    OW_pad = pl.cdiv(OW, 8) * 8           # sublane-aligned output columns per image row
    TOH = _choose_row_tile(OH, OW_pad)    # output rows per grid step
    R = pl.cdiv(OH, TOH)
    OH_pad = R * TOH
    HQ = OH_pad + (KH - 1) // s           # per-phase input row-quotients needed
    KWC = KW * C
    K = KH * KWC

    # ---- Host-side repack (one fused XLA pass, ~KW/stride x the bf16 input in HBM):
    # fold (kw, c) into lanes with the output stride applied, zero-pad ow and h, and
    # split the h axis by stride phase so every in-kernel tap is a contiguous window.
    xh = x.transpose(0, 2, 3, 1)                                          # NHWC
    cols = [xh[:, :, kw: kw + (OW - 1) * s + 1: s, :] for kw in range(KW)]
    xkw = jnp.stack(cols, axis=3).reshape(N, H, OW, KWC)                  # [n,h,ow,kw*C+c]
    xkw = jnp.pad(xkw, ((0, 0), (0, 0), (0, OW_pad - OW), (0, 0)))
    H_big = max(H, s * HQ)
    if H_big > H:
        xkw = jnp.pad(xkw, ((0, 0), (0, H_big - H), (0, 0), (0, 0)))
    xr = (xkw[:, : s * HQ]
          .reshape(N, HQ, s, OW_pad, KWC)
          .transpose(0, 2, 1, 3, 4)                                       # phase-major
          .reshape(N, s * HQ, OW_pad, KWC)
          .astype(jnp.bfloat16))

    # (KH*KW*C, OCp) bf16 weight; row index kh*KW*C + kw*C + c matches the LHS lanes.
    w_mat = weight.transpose(2, 3, 1, 0).reshape(K, OC).astype(jnp.bfloat16)
    w_mat = jnp.pad(w_mat, ((0, 0), (0, OCp - OC)))

    conv_out, stats = pl.pallas_call(
        functools.partial(_conv_stats_kernel, KH=KH, stride=s, HQ=HQ, TOH=TOH, OH=OH),
        out_shape=(jax.ShapeDtypeStruct((N, OH_pad, OW_pad, OCp), jnp.bfloat16),
                   jax.ShapeDtypeStruct((N, R, 2, OCp), jnp.float32)),
        grid=(N, R),
        in_specs=[
            pl.BlockSpec((1, s * HQ, OW_pad, KWC), lambda n, r: (n, 0, 0, 0)),
            pl.BlockSpec((K, OCp), lambda n, r: (0, 0),
                         pipeline_mode=pl.Buffered(1)),       # grid-invariant weights
        ],
        out_specs=(
            pl.BlockSpec((1, TOH, OW_pad, OCp), lambda n, r: (n, r, 0, 0)),
            pl.BlockSpec((1, 1, 2, OCp), lambda n, r: (n, r, 0, 0)),
        ),
        compiler_params=pltpu.CompilerParams(
            dimension_semantics=("parallel", "parallel"),
            vmem_limit_bytes=64 * 1024 * 1024),
    )(xr, w_mat)

    # Tiny (N*R, OCp) -> (OC,) reduction + BN scale/bias in plain JAX.
    cnt = float(N * OH * OW)
    ssum = stats[:, :, 0, :OC].sum(axis=(0, 1))
    ssq = stats[:, :, 1, :OC].sum(axis=(0, 1))
    mean = ssum / cnt
    var = jnp.maximum(ssq / cnt - mean * mean, 0.0)   # biased variance (torch forward)
    scale = gamma.astype(jnp.float32) * jax.lax.rsqrt(var + eps)
    bias = beta.astype(jnp.float32) - mean * scale
    scale_p = jnp.zeros((1, 1, OCp), jnp.float32).at[0, 0, :OC].set(scale)
    bias_p = jnp.zeros((1, 1, OCp), jnp.float32).at[0, 0, :OC].set(bias)

    # Fused BN affine + activation, emitting the compact NHWC result directly.
    y = pl.pallas_call(
        functools.partial(_bn_act_kernel, relu=relu, lrelu=lrelu, OW=OW, OC=OC),
        out_shape=jax.ShapeDtypeStruct((N, OH_pad, OW, OC), jnp.float32),
        grid=(N, R),
        in_specs=[
            pl.BlockSpec((1, TOH, OW_pad, OCp), lambda n, r: (n, r, 0, 0)),
            pl.BlockSpec((1, 1, OCp), lambda n, r: (0, 0, 0),
                         pipeline_mode=pl.Buffered(1)),
            pl.BlockSpec((1, 1, OCp), lambda n, r: (0, 0, 0),
                         pipeline_mode=pl.Buffered(1)),
        ],
        out_specs=pl.BlockSpec((1, TOH, OW, OC), lambda n, r: (n, r, 0, 0)),
        compiler_params=pltpu.CompilerParams(
            dimension_semantics=("parallel", "parallel"),
            vmem_limit_bytes=64 * 1024 * 1024),
    )(conv_out, scale_p, bias_p)

    if OH_pad != OH:
        y = y[:, :OH]
    # TODO(synk): keep NHWC end-to-end if the surrounding model can consume it; the
    # NCHW transpose below exists only to match the PyTorch module's convention.
    return y.transpose(0, 3, 1, 2)


def _reference(x, weight, gamma, beta, *, stride=1, relu=True, lrelu=False, eps=1e-5):
    y = jax.lax.conv_general_dilated(
        x, weight, window_strides=(stride, stride), padding="VALID",
        dimension_numbers=("NCHW", "OIHW", "NCHW"))
    mean = jnp.mean(y, axis=(0, 2, 3), keepdims=True)
    var = jnp.mean(jnp.square(y - mean), axis=(0, 2, 3), keepdims=True)
    y = (y - mean) / jnp.sqrt(var + eps) * gamma.reshape(1, -1, 1, 1) \
        + beta.reshape(1, -1, 1, 1)
    if relu:
        y = jnp.maximum(y, 0.0)
    if lrelu:
        y = jnp.where(y >= 0.0, y, 0.1 * y)
    return y


if __name__ == "__main__":
    key = jax.random.PRNGKey(0)
    k_x, k_w = jax.random.split(key)

    # Conv2dUnit(in_channels=4, out_channels=8, kernel_size=3) with defaults:
    # stride=1, dilation=1, padding=0, bias=False (bn=True), relu=True, lrelu=False.
    N, C, H, W = 2, 4, 16, 16
    OC, KH, KW = 8, 3, 3

    x = jax.random.normal(k_x, (N, C, H, W), dtype=jnp.float32)
    fan_in = C * KH * KW
    weight = jax.random.normal(k_w, (OC, C, KH, KW), dtype=jnp.float32) / jnp.sqrt(fan_in)
    gamma = jnp.ones((OC,), jnp.float32)    # BatchNorm2d default init
    beta = jnp.zeros((OC,), jnp.float32)

    out = conv2d_unit(x, weight, gamma, beta, stride=1, relu=True, lrelu=False)
    out = jax.block_until_ready(out)

    ref = _reference(x, weight, gamma, beta, stride=1, relu=True, lrelu=False)
    assert out.shape == (N, OC, H - KH + 1, W - KW + 1)
    # bf16 MXU operands + bf16 conv writeback (f32 accumulation/stats) -> relaxed tolerance.
    assert jnp.allclose(out, ref, atol=3e-2, rtol=3e-2), "mismatch vs JAX reference"

    print("KERNEL_OK")
</pallas_src>

<mosaic_0001>
module attributes {stable_mosaic.version = 11 : i64} {
  func.func @_conv_stats_kernel(%arg0: i32, %arg1: i32, %arg2: memref<1x16x16x12xbf16, #tpu.memory_space<vmem>>, %arg3: memref<36x128xbf16, #tpu.memory_space<vmem>>, %arg4: memref<1x14x16x128xbf16, #tpu.memory_space<vmem>>, %arg5: memref<1x1x2x128xf32, #tpu.memory_space<vmem>>) attributes {dimension_semantics = [#tpu.dimension_semantics<parallel>, #tpu.dimension_semantics<parallel>], iteration_bounds = array<i64: 2, 1>, scalar_prefetch = 0 : i64, scratch_operands = 0 : i64, tpu.core_type = #tpu.core_type<tc>, window_params = [{transform_indices = @transform_0, window_bounds = array<i64: 1, 16, 16, 12>}, {pipeline_mode = #tpu.pipeline_mode<synchronous>, transform_indices = @transform_1, window_bounds = array<i64: 36, 128>}, {transform_indices = @transform_2, window_bounds = array<i64: 1, 14, 16, 128>}, {transform_indices = @transform_3, window_bounds = array<i64: 1, 1, 2, 128>}]} {
    %c14_i32 = arith.constant 14 : i32
    %0 = arith.muli %arg1, %c14_i32 : i32
    %c0_i32 = arith.constant 0 : i32
    %1 = arith.addi %c0_i32, %0 : i32
    %c0_i32_0 = arith.constant 0 : i32
    %2 = arith.addi %1, %c0_i32_0 : i32
    %c0 = arith.constant 0 : index
    %3 = arith.index_cast %2 : i32 to index
    %c0_1 = arith.constant 0 : index
    %c0_2 = arith.constant 0 : index
    %4 = vector.load %arg2[%c0, %3, %c0_1, %c0_2] : memref<1x16x16x12xbf16, #tpu.memory_space<vmem>>, vector<1x14x16x12xbf16>
    %5 = vector.shape_cast %4 : vector<1x14x16x12xbf16> to vector<14x16x12xbf16>
    %6 = vector.shape_cast %5 : vector<14x16x12xbf16> to vector<224x12xbf16>
    %c14_i32_3 = arith.constant 14 : i32
    %7 = arith.muli %arg1, %c14_i32_3 : i32
    %c0_i32_4 = arith.constant 0 : i32
    %8 = arith.addi %c0_i32_4, %7 : i32
    %c1_i32 = arith.constant 1 : i32
    %9 = arith.addi %8, %c1_i32 : i32
    %c0_5 = arith.constant 0 : index
    %10 = arith.index_cast %9 : i32 to index
    %c0_6 = arith.constant 0 : index
    %c0_7 = arith.constant 0 : index
    %11 = vector.load %arg2[%c0_5, %10, %c0_6, %c0_7] : memref<1x16x16x12xbf16, #tpu.memory_space<vmem>>, vector<1x14x16x12xbf16>
    %12 = vector.shape_cast %11 : vector<1x14x16x12xbf16> to vector<14x16x12xbf16>
    %13 = vector.shape_cast %12 : vector<14x16x12xbf16> to vector<224x12xbf16>
    %c14_i32_8 = arith.constant 14 : i32
    %14 = arith.muli %arg1, %c14_i32_8 : i32
    %c0_i32_9 = arith.constant 0 : i32
    %15 = arith.addi %c0_i32_9, %14 : i32
    %c2_i32 = arith.constant 2 : i32
    %16 = arith.addi %15, %c2_i32 : i32
    %c0_10 = arith.constant 0 : index
    %17 = arith.index_cast %16 : i32 to index
    %c0_11 = arith.constant 0 : index
    %c0_12 = arith.constant 0 : index
    %18 = vector.load %arg2[%c0_10, %17, %c0_11, %c0_12] : memref<1x16x16x12xbf16, #tpu.memory_space<vmem>>, vector<1x14x16x12xbf16>
    %19 = vector.shape_cast %18 : vector<1x14x16x12xbf16> to vector<14x16x12xbf16>
    %20 = vector.shape_cast %19 : vector<14x16x12xbf16> to vector<224x12xbf16>
    %21 = tpu.concatenate %6, %13, %20 in 1 : vector<224x12xbf16>, vector<224x12xbf16>, vector<224x12xbf16> -> vector<224x36xbf16>
    %c0_13 = arith.constant 0 : index
    %c0_14 = arith.constant 0 : index
    %22 = vector.load %arg3[%c0_13, %c0_14] : memref<36x128xbf16, #tpu.memory_space<vmem>>, vector<36x128xbf16>
    %cst = arith.constant dense<0.000000e+00> : vector<224x128xf32>
    %23 = tpu.matmul %21, %22, %cst {dimension_numbers = #tpu.dot_dimension_numbers<[1], [0], [0], [1], [0, 0, 1, 1], [], []>} : vector<224x36xbf16>, vector<36x128xbf16>, vector<224x128xf32> -> vector<224x128xf32>
    %24 = vector.shape_cast %23 : vector<224x128xf32> to vector<14x16x128xf32>
    %25 = arith.truncf %24 : vector<14x16x128xf32> to vector<14x16x128xbf16>
    %c0_15 = arith.constant 0 : index
    %c0_16 = arith.constant 0 : index
    %c0_17 = arith.constant 0 : index
    %c0_18 = arith.constant 0 : index
    %26 = vector.load %arg4[%c0_15, %c0_16, %c0_17, %c0_18] : memref<1x14x16x128xbf16, #tpu.memory_space<vmem>>, vector<1x14x16x128xbf16>
    %27 = vector.shape_cast %26 : vector<1x14x16x128xbf16> to vector<14x16x128xbf16>
    %28 = vector.shape_cast %25 : vector<14x16x128xbf16> to vector<1x14x16x128xbf16>
    tpu.vector_store %arg4[%c0_15, %c0_16, %c0_17, %c0_18], %28 {strides = array<i32>} : memref<1x14x16x128xbf16, #tpu.memory_space<vmem>>, vector<1x14x16x128xbf16>,
    %cst_19 = arith.constant dense<0.000000e+00> : vector<128xf32>
    %29 = vector.multi_reduction <add>, %23, %cst_19 [0] : vector<224x128xf32> to vector<128xf32>
    %30 = vector.shape_cast %29 : vector<128xf32> to vector<1x128xf32>
    %c0_20 = arith.constant 0 : index
    %c0_21 = arith.constant 0 : index
    %c0_22 = arith.constant 0 : index
    %c0_23 = arith.constant 0 : index
    %31 = vector.load %arg5[%c0_20, %c0_21, %c0_22, %c0_23] : memref<1x1x2x128xf32, #tpu.memory_space<vmem>>, vector<1x1x1x128xf32>
    %32 = vector.shape_cast %31 : vector<1x1x1x128xf32> to vector<1x128xf32>
    %33 = vector.shape_cast %30 : vector<1x128xf32> to vector<1x1x1x128xf32>
    tpu.vector_store %arg5[%c0_20, %c0_21, %c0_22, %c0_23], %33 {strides = array<i32>} : memref<1x1x2x128xf32, #tpu.memory_space<vmem>>, vector<1x1x1x128xf32>,
    %34 = arith.mulf %23, %23 : vector<224x128xf32>
    %cst_24 = arith.constant dense<0.000000e+00> : vector<128xf32>
    %35 = vector.multi_reduction <add>, %34, %cst_24 [0] : vector<224x128xf32> to vector<128xf32>
    %36 = vector.shape_cast %35 : vector<128xf32> to vector<1x128xf32>
    %c0_25 = arith.constant 0 : index
    %c0_26 = arith.constant 0 : index
    %c1 = arith.constant 1 : index
    %c0_27 = arith.constant 0 : index
    %37 = vector.load %arg5[%c0_25, %c0_26, %c1, %c0_27] : memref<1x1x2x128xf32, #tpu.memory_space<vmem>>, vector<1x1x1x128xf32>
    %38 = vector.shape_cast %37 : vector<1x1x1x128xf32> to vector<1x128xf32>
    %39 = vector.shape_cast %36 : vector<1x128xf32> to vector<1x1x1x128xf32>
    tpu.vector_store %arg5[%c0_25, %c0_26, %c1, %c0_27], %39 {strides = array<i32>} : memref<1x1x2x128xf32, #tpu.memory_space<vmem>>, vector<1x1x1x128xf32>,
    return
  }
  func.func @transform_0(%arg0: i32, %arg1: i32) -> (i32, i32, i32, i32) {
    %c0_i32 = arith.constant 0 : i32
    %c0_i32_0 = arith.constant 0 : i32
    %c0_i32_1 = arith.constant 0 : i32
    %c0_i32_2 = arith.constant 0 : i32
    return %arg0, %c0_i32, %c0_i32_0, %c0_i32_1 : i32, i32, i32, i32
  }
  func.func @transform_1(%arg0: i32, %arg1: i32) -> (i32, i32) {
    %c0_i32 = arith.constant 0 : i32
    %c0_i32_0 = arith.constant 0 : i32
    %c0_i32_1 = arith.constant 0 : i32
    return %c0_i32, %c0_i32_0 : i32, i32
  }
  func.func @transform_2(%arg0: i32, %arg1: i32) -> (i32, i32, i32, i32) {
    %c0_i32 = arith.constant 0 : i32
    %c0_i32_0 = arith.constant 0 : i32
    %c0_i32_1 = arith.constant 0 : i32
    return %arg0, %arg1, %c0_i32, %c0_i32_0 : i32, i32, i32, i32
  }
  func.func @transform_3(%arg0: i32, %arg1: i32) -> (i32, i32, i32, i32) {
    %c0_i32 = arith.constant 0 : i32
    %c0_i32_0 = arith.constant 0 : i32
    %c0_i32_1 = arith.constant 0 : i32
    return %arg0, %arg1, %c0_i32, %c0_i32_0 : i32, i32, i32, i32
  }
}

</mosaic_0001>

<bundles_post_ra>
// kernel: tpu_custom_call.1
= control target key start
LH: loop header
LB: loop body
LE: loop exit
PB: predicated region body
PF: predicated region fallthrough
CT: control target
= control target key end

     0   :  { %9 = vsyncpa [#allocation3], 0  ;;  %s2332_s0 = inlined_call_operand.hbm [shape: bf16[2,16,16,12], index: 0, kind: input, shape index: {}]   ;;  %s2333_s1 = inlined_call_operand.hbm [shape: bf16[36,128], index: 1, kind: input, shape index: {}]   ;;  %s2334_s2 = inlined_call_operand.hbm [shape: bf16[2,14,16,128], index: 2, kind: output, shape index: {0}]   ;;  %s2335_s3 = inlined_call_operand.hbm [shape: f32[2,1,2,128], index: 3, kind: output, shape index: {1}]  }
   0x1   :  { %11 = vsyncpa [#allocation3 + $0x1], 0 }
   0x2   :  { %12 = vsyncpa [#allocation6], 0 }
   0x3   :  { %13 = vsyncpa [#allocation4], 0 }
   0x4   :  { %15 = vsyncpa [#allocation4 + $0x1], 0 }
   0x5   :  { %16 = vsyncpa [#allocation9], 0 }
   0x6   :  { %18 = vsyncpa [#allocation9 + $0x1], 0  ;;  %s1944_s12 = smov 0   ;;  %s1946_s13 = smov 0  }
   0x7   :  { %s1948_s14 = smov 0   ;;  %s1950_s15 = smov 0  }
   0x8   :  { %s1952_s16 = smov 0   ;;  %s1954_s17 = smov 0  }
   0x9 LB: > { %s1274_s18 = sadd.s32 4294967295, %s1912_s17   ;;  %s1275_s19 = sadd.s32 4294967294, %s1912_s17   ;;  %s1912_s17 = sphi %s1954_s17, %s24_s17   ;;  %s1908_s16 = sphi %s1952_s16, %s2359_s16   ;;  %s1904_s15 = sphi %s1950_s15, %s2358_s15   ;;  %s1900_s14 = sphi %s1948_s14, %s2357_s14   ;;  %s1896_s13 = sphi %s1946_s13, %s2356_s13   ;;  %s1892_s12 = sphi %s1944_s12, %s2355_s12  }
   0xa   : > { %p56_p0 = scmp.ne.s32.totalorder %s1896_s13, %s1892_s12  ;;  %p1978_p1 = scmp.eq.s32.totalorder %s1274_s18, 0 }
   0xb   : > { %p1982_p2 = scmp.eq.s32.totalorder %s1274_s18, 1  ;;  %p109_p3 = scmp.eq.s32.totalorder %s1275_s19, 1 }
   0xc   : > { %s2340_s20 = scalar_select %p1978_p1, 1, 0 }
   0xd   : > { %s2341_s21 = scalar_select %p1982_p2, 1, 0 }
   0xe   : > { %p1988_p4 = por %p1978_p1, %p56_p0  ;;  %p1276_p5 = scmp.ge.s32.totalorder %s1912_s17, 1 }
   0xf   : > { %p1993_p6 = por %p109_p3, %p56_p0  ;;  %p144_p7 = scmp.lt.s32.totalorder %s1912_s17, 3 }
  0x10   : > { %s2342_s22 = scalar_select %p1988_p4, 1, 0 }
  0x11   : > { %s2343_s23 = scalar_select %p1993_p6, 1, 0 }
  0x12   : > { %p1998_p8 = pnand %p1276_p5, %p144_p7  ;;  %s1914_s25 = smov [#allocation5]  }
  0x13   : > { %s156_s26 = sshll.u32 %s1914_s25, 4  ;;  %s36_s28 = sadd.s32 1, %s1908_s16  ;;  %s157_s26 = int_to_ptr.vmem [resolvable:$true] %s156_s26 }
  0x14   : > { %s2344_s24 = scalar_select %p1998_p8, 1, 0 }
  0x15   : > { %p1617_p9 = pneg %p1998_p8  ;;  %s1736_s4 = scalar_lea.hbm %s2333_s1, 320 }
  0x16   : > { %p1737_p12 = scmp.ne.s32.totalorder %s2333_s1, %s1736_s4  ;;  %p1743_p5 = scmp.lt.u32.totalorder %s1736_s4, %s2333_s1 }
  0x17   : > { %p2007_p11 = pnand %p1617_p9, %p1978_p1 }
  0x19   : > { %p1738_p13 = pneg %p2007_p11 }
  0x1b   : > { %p1739_p0 = pnand %p1738_p13, %p1737_p12 }
  0x1d   : > { %p1740_p3 = pneg %p1739_p0 }
  0x1f   : > { %p1745_p7 = pnand %p1743_p5, %p1740_p3 }
  0x21   : > { %1748 = shalt.err (!%p1745_p7)
}
  0x22   : > { %s1749_s9 = scalar_lea.vmem %s157_s26, 320  ;;  %p1757_p1 = scmp.lt.s32.totalorder %s157_s26, %s157_s26 }
  0x23   : > { %p1750_p9 = scmp.ne.s32.totalorder %s157_s26, %s1749_s9  ;;  %p1758_p4 = scmp.lt.s32.totalorder %s1749_s9, %s1749_s9 }
  0x25   : > { %p1752_p10 = pnand %p1750_p9, %p1738_p13  ;;  %p1759_p8 = por %p1758_p4, %p1757_p1 }
  0x27   : > { %p1753_p6 = pneg %p1752_p10 }
  0x29   : > { %p1760_p2 = pnand %p1759_p8, %p1753_p6 }
  0x2b   : > { %1763 = shalt.err (!%p1760_p2)
}
  0x2c   : > { %s1915_s10 = smov 64   ;;  %s1916_s11 = smov 4  }
  0x2d   : > { %1620 = dma.hbm_to_vmem [thread:$0]  (!%p2007_p11), %s2333_s1, 320, %s157_s26, [#allocation6], %s1915_s10, %s1915_s10, %s1916_s11  }
  0x2e   : > { %p38_p1 = scmp.ge.s32.totalorder %s36_s28, 2  ;;  %s43_s25 = sadd.s32 1, %s1900_s14 }
  0x2f   : > { %p50_p2 = scmp.ne.s32.totalorder %s1900_s14, %s1896_s13  ;;  %p51_p4 = scmp.eq.s32.totalorder %s1912_s17, 0 }
  0x30   : > { %s2361_s28 = smov (%p38_p1, %s36_s28), 0  ;;  %p2347_p8 = scmp.ne.s32.totalorder %s2341_s21, 0 }
  0x31   : > { %p2037_p6 = por %p51_p4, %p50_p2  ;;  %s40_s30 = ssub.s32 %s1908_s16, %s2361_s28 }
  0x32   : > { %p2043_p10 = por %p2347_p8, %p50_p2  ;;  %p1633_p12 = scmp.lt.s32.totalorder %s1912_s17, 2 }
  0x33   : > { %p41_p11 = scmp.eq.s32.totalorder %s40_s30, 0  ;;  %s170_s26 = sand.u32 1, %s1900_s14  }
  0x34   : > { %s1279_s4 = sshll.u32 %s170_s26, 7  ;;  %s1434_s6 = sshll.u32 %s1908_s16, 11 }
  0x35   : > { %s2052_s5 = scalar_select %p41_p11, %s1900_s14, %s43_s25  }
  0x36   : > { %s2058_s9 = scalar_lea.hbm %s2332_s0, %s1434_s6  ;;  %s174_s21 = scalar_lea.vmem [#allocation2], %s1279_s4 }
  0x37   : > { %s181_s18 = sshll.u32 %s174_s21, 4  ;;  %p2064_p13 = pnand %p1633_p12, %p2037_p6  ;;  %s2060_s18 = int_to_ptr.vmem [resolvable:$true] %s181_s18 }
  0x38   : > { %s2068_s25 = scalar_lea.sflag [#allocation3], %s170_s26  ;;  %s1764_s30 = scalar_lea.hbm %s2058_s9, 2048 }
  0x39   : > { %p1765_p0 = scmp.ne.s32.totalorder %s2058_s9, %s1764_s30  ;;  %p1766_p3 = pneg %p2064_p13 }
  0x3a   : > { %s1769_s29 = scalar_lea.hbm %s2332_s0, 4096  ;;  %p1770_p9 = scmp.lt.u32.totalorder %s2058_s9, %s2332_s0 }
  0x3b   : > { %p1767_p5 = pnand %p1766_p3, %p1765_p0  ;;  %p1771_p1 = scmp.lt.u32.totalorder %s1769_s29, %s1764_s30 }
  0x3c   : > { %p1773_p4 = scmp.lt.u32.totalorder %s1764_s30, %s2058_s9 }
  0x3d   : > { %p1768_p7 = pneg %p1767_p5  ;;  %p1772_p2 = por %p1771_p1, %p1770_p9 }
  0x3f   : > { %p1774_p6 = por %p1773_p4, %p1772_p2 }
  0x41   : > { %p1775_p8 = pnand %p1774_p6, %p1768_p7 }
  0x43   : > { %1778 = shalt.err (!%p1775_p8)
}
  0x44   : > { %s1779_s26 = scalar_lea.vmem %s2060_s18, 2048  ;;  %s1917_s21 = smov [#allocation2]  }
  0x45   : > { %p1780_p12 = scmp.ne.s32.totalorder %s2060_s18, %s1779_s26  ;;  %s1784_s4 = sshll.u32 %s1917_s21, 4  ;;  %s1785_s4 = int_to_ptr.vmem [resolvable:$false] %s1784_s4 }
  0x46   : > { %s1786_s6 = scalar_lea.vmem %s1785_s4, 4096  ;;  %p1787_p5 = scmp.lt.s32.totalorder %s2060_s18, %s1785_s4 }
  0x47   : > { %p1782_p11 = pnand %p1780_p12, %p1766_p3  ;;  %p1788_p9 = scmp.lt.s32.totalorder %s1786_s6, %s1779_s26 }
  0x49   : > { %p1783_p0 = pneg %p1782_p11  ;;  %p1789_p1 = por %p1788_p9, %p1787_p5 }
  0x4b   : > { %p1790_p2 = pnand %p1789_p1, %p1783_p0 }
  0x4d   : > { %1793 = shalt.err (!%p1790_p2)
}
  0x4e   : > { %1624 = dma.hbm_to_vmem [thread:$0]  (!%p2064_p13), %s2058_s9, 2048, %s2060_s18, %s2068_s25, %s1915_s10, %s1915_s10, %s1916_s11  }
  0x4f   : > { %p2350_p3 = scmp.ne.s32.totalorder %s2344_s24, 0 }
  0x50   : > { %s2102_s30 = sand.u32 (!%p2350_p3), 1, %s1896_s13   ;;  %p2351_p7 = scmp.ne.s32.totalorder (!%p2350_p3), %s2342_s22, 0 }
  0x51   : > { %193 = sbr.rel (%p2350_p3) target bundleno = 522 (0x20a), region = 28  ;;  %s1283_s29 = sshll.u32 (!%p2350_p3), %s2102_s30, 7 }
  0x52   : > { %s196_s7 = scalar_lea.sflag (!%p2350_p3), [#allocation3], %s2102_s30  ;;  %s2106_s8 = scalar_lea.vmem (!%p2350_p3), [#allocation2], %s1283_s29 }
  0x58   : > { %1875 = dma.done.wait (%p2351_p7), %s196_s7, 2048  }
  0x59   : > { %1877 = vsyncadd (%p2351_p7), %s196_s7, 4294965248  ;;  %p2352_p13 = scmp.ne.s32.totalorder %s2340_s20, 0 }
  0x5b   : > { %1879 = dma.done.wait (%p2352_p13), [#allocation6], 320  }
  0x5c   : > { %1881 = vsyncadd (%p2352_p13), [#allocation6], 4294966976  ;;  %v1691_v0 = vld [vmem:[%s2106_s8 + $0x10] sm:$0xff]   ;;  %v1692_v1 = vld [vmem:[%s2106_s8 + $0x8] sm:$0xff]   ;;  %s1918_s24 = smov 24   ;;  %s1919_s22 = smov 12  }
  0x5d   : > { %567 = vrot.lane.b32.xlu1 %v1691_v0, %s1918_s24  ;;  %v1693_v2 = vld [vmem:[%s2106_s8 + $0x18] sm:$0xff]   ;;  %469 = vrot.lane.b32.xlu0 %v1692_v1, %s1919_s22  ;;  %v1694_v3 = vld [vmem:[%s2106_s8 + $0x10] sm:$0xff]   ;;  %v1719_v16 = vld [vmem:[#allocation5] sm:$0xff]   ;;  %vm716_vm0 = vcmask 1041408   ;;  %vm595_vm1 = vcmask 97280   ;;  %vm638_vm2 = vcmask 195584  }
  0x5e   : > { %v1695_v4 = vld [vmem:[%s2106_s8 + $0x20] sm:$0xff]   ;;  %v1696_v5 = vld [vmem:[%s2106_s8 + $0x18] sm:$0xff]   ;;  %v1697_v6 = vld [vmem:[%s2106_s8 + $0x28] sm:$0xff]   ;;  %1563 = vmatprep.subr.bf16.mxu0 %v1719_v16  ;;  %1597 = vmatprep.subr.bf16.mxu1 %v1719_v16  ;;  %vm687_vm3 = vcmask 293888   ;;  %s1605_s20 = smul.u32 112, %s2102_s30  ;;  %s1102_s26 = scalar_lea.sflag [#allocation4], %s2102_s30 }
  0x5f   : > { %v1698_v7 = vld [vmem:[%s2106_s8 + $0x20] sm:$0xff]   ;;  %v1699_v8 = vld [vmem:[%s2106_s8 + $0x30] sm:$0xff]   ;;  %v1700_v9 = vld [vmem:[%s2106_s8 + $0x28] sm:$0xff]   ;;  %1564 = vmatpush3.bf16.msra.mxu0 %v1719_v16  ;;  %1600 = vmatpush3.bf16.msra.mxu1 %v1719_v16  ;;  %s1606_s11 = smul.u32 1792, %s1904_s15  ;;  %s1920_s4 = smov [#allocation7]  }
  0x60   : > { %v1701_v10 = vld [vmem:[%s2106_s8 + $0x38] sm:$0xff]   ;;  %v1702_v11 = vld [vmem:[%s2106_s8 + $0x30] sm:$0xff]   ;;  %v1703_v12 = vld [vmem:[%s2106_s8 + $0x40] sm:$0xff]   ;;  %s2229_s10 = scalar_lea.vmem [#allocation7], %s1605_s20  ;;  %s1798_s6 = sshll.u32 %s1920_s4, 4  ;;  %s1799_s6 = int_to_ptr.vmem [resolvable:$false] %s1798_s6 }
  0x61   : > { %569 = vrot.lane.b32.xlu1 %v1693_v2, %s1918_s24  ;;  %471 = vrot.lane.b32.xlu0 %v1694_v3, %s1919_s22  ;;  %v1704_v13 = vld [vmem:[%s2106_s8 + $0x38] sm:$0xff]   ;;  %v1705_v14 = vld [vmem:[%s2106_s8 + $0x48] sm:$0xff]   ;;  %v1722_v20 = vld [vmem:[#allocation5 + $0x10] ss:$0 sps:$4 sm:$0x33]   ;;  %s1123_s9 = sshll.u32 %s2229_s10, 4  ;;  %s2248_s25 = scalar_lea.hbm %s2334_s2, %s1606_s11  ;;  %s2250_s9 = int_to_ptr.vmem [resolvable:$true] %s1123_s9 }
  0x62   : > { %v1706_v15 = vld [vmem:[%s2106_s8 + $0x40] sm:$0xff]   ;;  %v1720_v17 = vld [vmem:[#allocation5 + $0x8] sm:$0xff]   ;;  %v1707_v18 = vld [vmem:[%s2106_s8 + $0x50] sm:$0xff]   ;;  %v718_v23 = vsel %vm716_vm0, %v1722_v20, 0  ;;  %s1794_s21 = scalar_lea.vmem %s2250_s9, 1792  ;;  %s1800_s29 = scalar_lea.vmem %s1799_s6, 3584 }
  0x63   : > { %v1708_v19 = vld [vmem:[%s2106_s8 + $0x48] sm:$0xff]   ;;  %1565 = vmatprep.subr.bf16.mxu0 %v1720_v17  ;;  %v1709_v21 = vld [vmem:[%s2106_s8 + $0x58] sm:$0xff]   ;;  %1598 = vmatprep.subr.bf16.mxu1 %v1720_v17  ;;  %v1710_v22 = vld [vmem:[%s2106_s8 + $0x50] sm:$0xff]   ;;  %p1795_p4 = scmp.ne.s32.totalorder %s2250_s9, %s1794_s21  ;;  %p1801_p12 = scmp.lt.s32.totalorder %s2250_s9, %s1799_s6 }
  0x64   : > { %1566 = vmatpush3.bf16.msra.mxu0 %v1720_v17  ;;  %1601 = vmatpush3.bf16.msra.mxu1 %v1720_v17  ;;  %v1711_v24 = vld [vmem:[%s2106_s8 + $0x60] sm:$0xff]   ;;  %v1712_v25 = vld [vmem:[%s2106_s8 + $0x58] sm:$0xff]   ;;  %v1713_v26 = vld [vmem:[%s2106_s8 + $0x68] sm:$0xff]   ;;  %p1802_p11 = scmp.lt.s32.totalorder %s1800_s29, %s1794_s21 }
  0x65   : > { %475 = vrot.lane.b32.xlu1 %v1695_v4, %s1919_s22  ;;  %473 = vrot.lane.b32.xlu0 %v1696_v5, %s1919_s22  ;;  %v1714_v27 = vld [vmem:[%s2106_s8 + $0x60] sm:$0xff]   ;;  %v1715_v28 = vld [vmem:[%s2106_s8 + $0x70] sm:$0xff]   ;;  %p1796_p6 = pnand %p1795_p4, %p2043_p10 }
  0x66   : > { %1603 = vmatprep.subr.msk.bf16.mxu0 %vm716_vm0, %v1722_v20  ;;  %1604 = vmatprep.subr.msk.bf16.mxu1 %vm716_vm0, %v1722_v20  ;;  %v1716_v29 = vld [vmem:[%s2106_s8 + $0x68] sm:$0xff]   ;;  %v1717_v30 = vld [vmem:[%s2106_s8 + $0x78] sm:$0xff]   ;;  %v1718_v31 = vld [vmem:[%s2106_s8 + $0x70] sm:$0xff]   ;;  %p1803_p0 = por %p1802_p11, %p1801_p12 }
  0x67   : > { %v1721_v32 = vld [vmem:[%s2106_s8] sm:$0xff]   ;;  %v1723_v36 = vld [vmem:[%s2106_s8 + $0x8] sm:$0xff]   ;;  %v1724_v43 = vld [vmem:[%s2106_s8 + $0x18] sm:$0xff]   ;;  %p1797_p8 = pneg %p1796_p6 }
  0x68   : > { %1568 = vmatpush3.bf16.msra.mxu0 %v718_v23  ;;  %1602 = vmatpush3.bf16.msra.mxu1 %v718_v23  ;;  %v1725_v45 = vld [vmem:[%s2106_s8 + $0x10] sm:$0xff]   ;;  %v1726_v53 = vld [vmem:[%s2106_s8 + $0x28] sm:$0xff]   ;;  %v1727_v55 = vld [vmem:[%s2106_s8 + $0x20] sm:$0xff]  }
  0x69   : > { %573 = vrot.lane.b32.xlu1 %v1697_v6, %s1918_s24  ;;  %571 = vrot.lane.b32.xlu0 %v1698_v7, %s1918_s24  ;;  %v1728_v63 = vld [vmem:[%s2106_s8 + $0x38] sm:$0xff]   ;;  %v1729_v1 = vld [vmem:[%s2106_s8 + $0x30] sm:$0xff]   ;;  %p1804_p5 = pnand %p1803_p0, %p1797_p8 }
  0x6d   : > { %479 = vrot.lane.b32.xlu1 %v1699_v8, %s1919_s22  ;;  %477 = vrot.lane.b32.xlu0 %v1700_v9, %s1919_s22  ;;  %v1730_v9 = vld [vmem:[%s2106_s8 + $0x48] sm:$0xff]  }
  0x71   : > { %577 = vrot.lane.b32.xlu1 %v1701_v10, %s1918_s24  ;;  %575 = vrot.lane.b32.xlu0 %v1702_v11, %s1918_s24  ;;  %v1731_v11 = vld [vmem:[%s2106_s8 + $0x40] sm:$0xff]  }
  0x75   : > { %483 = vrot.lane.b32.xlu1 %v1703_v12, %s1919_s22  ;;  %481 = vrot.lane.b32.xlu0 %v1704_v13, %s1919_s22 }
  0x79   : > { %581 = vrot.lane.b32.xlu1 %v1705_v14, %s1918_s24  ;;  %579 = vrot.lane.b32.xlu0 %v1706_v15, %s1918_s24 }
  0x7d   : > { %487 = vrot.lane.b32.xlu1 %v1707_v18, %s1919_s22  ;;  %485 = vrot.lane.b32.xlu0 %v1708_v19, %s1919_s22  ;;  %v1732_v19 = vld [vmem:[%s2106_s8 + $0x58] sm:$0xff]  }
  0x81   : > { %585 = vrot.lane.b32.xlu1 %v1709_v21, %s1918_s24  ;;  %583 = vrot.lane.b32.xlu0 %v1710_v22, %s1918_s24  ;;  %v1733_v21 = vld [vmem:[%s2106_s8 + $0x50] sm:$0xff]  }
  0x85   : > { %491 = vrot.lane.b32.xlu1 %v1711_v24, %s1919_s22  ;;  %489 = vrot.lane.b32.xlu0 %v1712_v25, %s1919_s22 }
  0x89   : > { %589 = vrot.lane.b32.xlu1 %v1713_v26, %s1918_s24  ;;  %587 = vrot.lane.b32.xlu0 %v1714_v27, %s1918_s24 }
  0x8d   : > { %495 = vrot.lane.b32.xlu1 %v1715_v28, %s1919_s22  ;;  %493 = vrot.lane.b32.xlu0 %v1716_v29, %s1919_s22  ;;  %v1734_v29 = vld [vmem:[%s2106_s8 + $0x68] sm:$0xff]  }
  0x91   : > { %593 = vrot.lane.b32.xlu1 %v1717_v30, %s1918_s24  ;;  %591 = vrot.lane.b32.xlu0 %v1718_v31, %s1918_s24  ;;  %v1735_v31 = vld [vmem:[%s2106_s8 + $0x60] sm:$0xff]  }
  0xcf   : > { %v568_v33 = vpop.permute.xlu1 %567  ;;  %v470_v34 = vpop.permute.xlu0 %469 }
  0xd0   : > { %v598_v35 = vsel %vm595_vm1, %v1721_v32, %v470_v34 }
  0xd1   : > { %v640_v37 = vsel %vm638_vm2, %v598_v35, %v568_v33 }
  0xd2   : > { %1569 = vmatprep.mubr.msk.bf16.mxu0 %vm687_vm3, %v640_v37 }
  0xd3   : > { %v570_v38 = vpop.permute.xlu1 %569  ;;  %v472_v39 = vpop.permute.xlu0 %471 }
  0xd4   : > { %v601_v40 = vsel %vm595_vm1, %v1723_v36, %v472_v39 }
  0xd5   : > { %v642_v41 = vsel %vm638_vm2, %v601_v40, %v570_v38 }
  0xd6   : > { %1570 = vmatmul.mubr.msk.bf16.vlgmr.msra.gmra.mrb[0].mxu0 %vm687_vm3, %v642_v41 }
  0xd7   : > { %v476_v42 = vpop.permute.xlu1 %475  ;;  %v474_v44 = vpop.permute.xlu0 %473 }
  0xd8   : > { %v607_v46 = vsel %vm595_vm1, %v1724_v43, %v476_v42  ;;  %v604_v48 = vsel %vm595_vm1, %v1725_v45, %v474_v44 }
  0xdb   : > { %v574_v47 = vpop.permute.xlu1 %573  ;;  %v572_v50 = vpop.permute.xlu0 %571 }
  0xdc   : > { %v646_v49 = vsel %vm638_vm2, %v607_v46, %v574_v47  ;;  %v644_v51 = vsel %vm638_vm2, %v604_v48, %v572_v50 }
  0xdd   : > { %1573 = vmatprep.mubr.msk.bf16.mxu0 %vm687_vm3, %v644_v51 }
  0xde   : > { %1574 = vmatmul.mubr.msk.bf16.gmra.mrb[4].mxu0 %vm687_vm3, %v646_v49 }
  0xdf   : > { %v480_v52 = vpop.permute.xlu1 %479  ;;  %v478_v54 = vpop.permute.xlu0 %477 }
  0xe0   : > { %v613_v56 = vsel %vm595_vm1, %v1726_v53, %v480_v52  ;;  %v610_v58 = vsel %vm595_vm1, %v1727_v55, %v478_v54 }
  0xe3   : > { %v578_v57 = vpop.permute.xlu1 %577  ;;  %v576_v60 = vpop.permute.xlu0 %575 }
  0xe4   : > { %v650_v59 = vsel %vm638_vm2, %v613_v56, %v578_v57  ;;  %v648_v61 = vsel %vm638_vm2, %v610_v58, %v576_v60 }
  0xe5   : > { %1577 = vmatprep.mubr.msk.bf16.mxu0 %vm687_vm3, %v648_v61 }
  0xe6   : > { %1578 = vmatmul.mubr.msk.bf16.gmra.mrb[8].mxu0 %vm687_vm3, %v650_v59 }
  0xe7   : > { %v484_v62 = vpop.permute.xlu1 %483  ;;  %v482_v0 = vpop.permute.xlu0 %481 }
  0xe8   : > { %v619_v2 = vsel %vm595_vm1, %v1728_v63, %v484_v62  ;;  %v616_v4 = vsel %vm595_vm1, %v1729_v1, %v482_v0 }
  0xeb   : > { %v582_v3 = vpop.permute.xlu1 %581  ;;  %v580_v6 = vpop.permute.xlu0 %579 }
  0xec   : > { %v654_v5 = vsel %vm638_vm2, %v619_v2, %v582_v3  ;;  %v652_v7 = vsel %vm638_vm2, %v616_v4, %v580_v6 }
  0xed   : > { %1581 = vmatprep.mubr.msk.bf16.mxu0 %vm687_vm3, %v652_v7 }
  0xee   : > { %1582 = vmatmul.mubr.msk.bf16.gmra.mrb[12].mxu0 %vm687_vm3, %v654_v5 }
  0xef   : > { %v488_v8 = vpop.permute.xlu1 %487  ;;  %v486_v10 = vpop.permute.xlu0 %485 }
  0xf0   : > { %v625_v12 = vsel %vm595_vm1, %v1730_v9, %v488_v8  ;;  %v622_v14 = vsel %vm595_vm1, %v1731_v11, %v486_v10 }
  0xf3   : > { %v586_v13 = vpop.permute.xlu1 %585  ;;  %v584_v16 = vpop.permute.xlu0 %583 }
  0xf4   : > { %v658_v15 = vsel %vm638_vm2, %v625_v12, %v586_v13  ;;  %v656_v17 = vsel %vm638_vm2, %v622_v14, %v584_v16 }
  0xf5   : > { %1585 = vmatprep.mubr.msk.bf16.mxu1 %vm687_vm3, %v656_v17 }
  0xf6   : > { %1586 = vmatmul.mubr.msk.bf16.vlgmr.msra.gmra.mrb[0].mxu1 %vm687_vm3, %v658_v15 }
  0xf7   : > { %v492_v18 = vpop.permute.xlu1 %491  ;;  %v490_v20 = vpop.permute.xlu0 %489 }
  0xf8   : > { %v631_v22 = vsel %vm595_vm1, %v1732_v19, %v492_v18  ;;  %v628_v24 = vsel %vm595_vm1, %v1733_v21, %v490_v20 }
  0xfb   : > { %v590_v23 = vpop.permute.xlu1 %589  ;;  %v588_v26 = vpop.permute.xlu0 %587 }
  0xfc   : > { %v662_v25 = vsel %vm638_vm2, %v631_v22, %v590_v23  ;;  %v660_v27 = vsel %vm638_vm2, %v628_v24, %v588_v26 }
  0xfd   : > { %1589 = vmatprep.mubr.msk.bf16.mxu1 %vm687_vm3, %v660_v27 }
  0xfe   : > { %1590 = vmatmul.mubr.msk.bf16.gmra.mrb[4].mxu1 %vm687_vm3, %v662_v25 }
  0xff   : > { %v496_v28 = vpop.permute.xlu1 %495  ;;  %v494_v30 = vpop.permute.xlu0 %493 }
 0x100   : > { %v637_v32 = vsel %vm595_vm1, %v1734_v29, %v496_v28  ;;  %v634_v34 = vsel %vm595_vm1, %v1735_v31, %v494_v30 }
 0x103   : > { %v594_v33 = vpop.permute.xlu1 %593  ;;  %v592_v36 = vpop.permute.xlu0 %591 }
 0x104   : > { %v666_v35 = vsel %vm638_vm2, %v637_v32, %v594_v33  ;;  %v664_v37 = vsel %vm638_vm2, %v634_v34, %v592_v36 }
 0x105   : > { %1593 = vmatprep.mubr.msk.bf16.mxu1 %vm687_vm3, %v664_v37 }
 0x106   : > { %1594 = vmatmul.mubr.msk.bf16.gmra.mrb[8].mxu1 %vm687_vm3, %v666_v35 }
 0x1a9   : > { %v1571_v38 = vpop.f32.mrb[0].mxu0 }
 0x1aa   : > { %v754_v39 = vpop.f32.mrb[1].mxu0  ;;  %v1041_v47 = vmul.f32 %v1571_v38, %v1571_v38 }
 0x1ab   : > { %v1572_v40 = vpop.f32.mrb[2].mxu0  ;;  %v1039_v43 = vmul.f32 %v754_v39, %v754_v39 }
 0x1ac   : > { %v1471_v41 = vpack.c.bf16 %v1572_v40, %v1571_v38  ;;  %v757_v42 = vpop.f32.mrb[3].mxu0  ;;  %v1042_v50 = vmul.f32 %v1572_v40, %v1572_v40 }
 0x1ad   : > { %v1466_v44 = vpack.c.bf16 %v757_v42, %v754_v39  ;;  %v1005_v45 = vadd.f32 %v757_v42, %v754_v39  ;;  %v1040_v46 = vmul.f32 %v757_v42, %v757_v42 }
 0x1ae   : > { %1533 = vst [vmem:[%s2229_s10 + $0x8] sm:$0xff] %v1471_v41  }
 0x1af   : > { %1467 = vst [vmem:[%s2229_s10] sm:$0xff] %v1466_v44   ;;  %v1006_v48 = vadd.f32 %v1571_v38, %v1005_v45  ;;  %v1067_v49 = vadd.f32 %v1040_v46, %v1039_v43 }
 0x1b1   : > { %v1068_v51 = vadd.f32 %v1067_v49, %v1041_v47  ;;  %v1575_v52 = vpop.f32.mrb[4].mxu0  ;;  %v1007_v53 = vadd.f32 %v1572_v40, %v1006_v48 }
 0x1b2   : > { %v770_v54 = vpop.f32.mrb[5].mxu0  ;;  %v1045_v1 = vmul.f32 %v1575_v52, %v1575_v52 }
 0x1b3   : > { %v1008_v55 = vadd.f32 %v1007_v53, %v770_v54  ;;  %v1043_v56 = vmul.f32 %v770_v54, %v770_v54  ;;  %v1069_v57 = vadd.f32 %v1068_v51, %v1042_v50  ;;  %v1576_v58 = vpop.f32.mrb[6].mxu0 }
 0x1b4   : > { %v1481_v59 = vpack.c.bf16 %v1576_v58, %v1575_v52  ;;  %v773_v60 = vpop.f32.mrb[7].mxu0  ;;  %v1046_v4 = vmul.f32 %v1576_v58, %v1576_v58 }
 0x1b5   : > { %v1070_v61 = vadd.f32 %v1069_v57, %v1043_v56  ;;  %v1476_v62 = vpack.c.bf16 %v773_v60, %v770_v54  ;;  %v1009_v63 = vadd.f32 %v1008_v55, %v773_v60  ;;  %v1044_v0 = vmul.f32 %v773_v60, %v773_v60 }
 0x1b6   : > { %1535 = vst [vmem:[%s2229_s10 + $0x18] sm:$0xff] %v1481_v59  }
 0x1b7   : > { %1534 = vst [vmem:[%s2229_s10 + $0x10] sm:$0xff] %v1476_v62   ;;  %v1010_v2 = vadd.f32 %v1575_v52, %v1009_v63  ;;  %v1071_v3 = vadd.f32 %v1070_v61, %v1044_v0 }
 0x1b9   : > { %v1072_v5 = vadd.f32 %v1071_v3, %v1045_v1  ;;  %v1579_v6 = vpop.f32.mrb[8].mxu0  ;;  %v1011_v7 = vadd.f32 %v1576_v58, %v1010_v2 }
 0x1ba   : > { %v786_v8 = vpop.f32.mrb[9].mxu0  ;;  %v1049_v19 = vmul.f32 %v1579_v6, %v1579_v6 }
 0x1bb   : > { %v1012_v9 = vadd.f32 %v1011_v7, %v786_v8  ;;  %v1047_v10 = vmul.f32 %v786_v8, %v786_v8  ;;  %v1073_v11 = vadd.f32 %v1072_v5, %v1046_v4  ;;  %v1580_v12 = vpop.f32.mrb[10].mxu0 }
 0x1bc   : > { %v1491_v13 = vpack.c.bf16 %v1580_v12, %v1579_v6  ;;  %v789_v14 = vpop.f32.mrb[11].mxu0  ;;  %v1050_v22 = vmul.f32 %v1580_v12, %v1580_v12 }
 0x1bd   : > { %v1074_v15 = vadd.f32 %v1073_v11, %v1047_v10  ;;  %v1486_v16 = vpack.c.bf16 %v789_v14, %v786_v8  ;;  %v1013_v17 = vadd.f32 %v1012_v9, %v789_v14  ;;  %v1048_v18 = vmul.f32 %v789_v14, %v789_v14 }
 0x1be   : > { %1537 = vst [vmem:[%s2229_s10 + $0x28] sm:$0xff] %v1491_v13  }
 0x1bf   : > { %1536 = vst [vmem:[%s2229_s10 + $0x20] sm:$0xff] %v1486_v16   ;;  %v1014_v20 = vadd.f32 %v1579_v6, %v1013_v17  ;;  %v1075_v21 = vadd.f32 %v1074_v15, %v1048_v18 }
 0x1c1   : > { %v1076_v23 = vadd.f32 %v1075_v21, %v1049_v19  ;;  %v1583_v24 = vpop.f32.mrb[12].mxu0  ;;  %v1015_v25 = vadd.f32 %v1580_v12, %v1014_v20 }
 0x1c2   : > { %v802_v26 = vpop.f32.mrb[13].mxu0  ;;  %v1053_v37 = vmul.f32 %v1583_v24, %v1583_v24 }
 0x1c3   : > { %v1016_v27 = vadd.f32 %v1015_v25, %v802_v26  ;;  %v1051_v28 = vmul.f32 %v802_v26, %v802_v26  ;;  %v1077_v29 = vadd.f32 %v1076_v23, %v1050_v22  ;;  %v1584_v30 = vpop.f32.mrb[14].mxu0 }
 0x1c4   : > { %v1501_v31 = vpack.c.bf16 %v1584_v30, %v1583_v24  ;;  %v805_v32 = vpop.f32.mrb[15].mxu0  ;;  %v1054_v40 = vmul.f32 %v1584_v30, %v1584_v30 }
 0x1c5   : > { %v1078_v33 = vadd.f32 %v1077_v29, %v1051_v28  ;;  %v1496_v34 = vpack.c.bf16 %v805_v32, %v802_v26  ;;  %v1017_v35 = vadd.f32 %v1016_v27, %v805_v32  ;;  %v1052_v36 = vmul.f32 %v805_v32, %v805_v32 }
 0x1c6   : > { %1539 = vst [vmem:[%s2229_s10 + $0x38] sm:$0xff] %v1501_v31  }
 0x1c7   : > { %1538 = vst [vmem:[%s2229_s10 + $0x30] sm:$0xff] %v1496_v34   ;;  %v1018_v38 = vadd.f32 %v1583_v24, %v1017_v35  ;;  %v1079_v39 = vadd.f32 %v1078_v33, %v1052_v36 }
 0x1c9   : > { %v1080_v41 = vadd.f32 %v1079_v39, %v1053_v37  ;;  %v1587_v42 = vpop.f32.mrb[0].mxu1  ;;  %v1019_v43 = vadd.f32 %v1584_v30, %v1018_v38 }
 0x1ca   : > { %v818_v44 = vpop.f32.mrb[1].mxu1  ;;  %v1057_v55 = vmul.f32 %v1587_v42, %v1587_v42 }
 0x1cb   : > { %v1020_v45 = vadd.f32 %v1019_v43, %v818_v44  ;;  %v1055_v46 = vmul.f32 %v818_v44, %v818_v44  ;;  %v1081_v47 = vadd.f32 %v1080_v41, %v1054_v40  ;;  %v1588_v48 = vpop.f32.mrb[2].mxu1 }
 0x1cc   : > { %v1511_v49 = vpack.c.bf16 %v1588_v48, %v1587_v42  ;;  %v821_v50 = vpop.f32.mrb[3].mxu1  ;;  %v1058_v58 = vmul.f32 %v1588_v48, %v1588_v48 }
 0x1cd   : > { %v1082_v51 = vadd.f32 %v1081_v47, %v1055_v46  ;;  %v1506_v52 = vpack.c.bf16 %v821_v50, %v818_v44  ;;  %v1021_v53 = vadd.f32 %v1020_v45, %v821_v50  ;;  %v1056_v54 = vmul.f32 %v821_v50, %v821_v50 }
 0x1ce   : > { %1541 = vst [vmem:[%s2229_s10 + $0x48] sm:$0xff] %v1511_v49  }
 0x1cf   : > { %1540 = vst [vmem:[%s2229_s10 + $0x40] sm:$0xff] %v1506_v52   ;;  %v1022_v56 = vadd.f32 %v1587_v42, %v1021_v53  ;;  %v1083_v57 = vadd.f32 %v1082_v51, %v1056_v54 }
 0x1d1   : > { %v1084_v59 = vadd.f32 %v1083_v57, %v1057_v55  ;;  %v1591_v60 = vpop.f32.mrb[4].mxu1  ;;  %v1023_v61 = vadd.f32 %v1588_v48, %v1022_v56 }
 0x1d2   : > { %v834_v62 = vpop.f32.mrb[5].mxu1  ;;  %v1061_v9 = vmul.f32 %v1591_v60, %v1591_v60 }
 0x1d3   : > { %v1024_v63 = vadd.f32 %v1023_v61, %v834_v62  ;;  %v1059_v0 = vmul.f32 %v834_v62, %v834_v62  ;;  %v1085_v1 = vadd.f32 %v1084_v59, %v1058_v58  ;;  %v1592_v2 = vpop.f32.mrb[6].mxu1 }
 0x1d4   : > { %v1521_v3 = vpack.c.bf16 %v1592_v2, %v1591_v60  ;;  %v837_v4 = vpop.f32.mrb[7].mxu1  ;;  %v1062_v12 = vmul.f32 %v1592_v2, %v1592_v2 }
 0x1d5   : > { %v1086_v5 = vadd.f32 %v1085_v1, %v1059_v0  ;;  %v1516_v6 = vpack.c.bf16 %v837_v4, %v834_v62  ;;  %v1025_v7 = vadd.f32 %v1024_v63, %v837_v4  ;;  %v1060_v8 = vmul.f32 %v837_v4, %v837_v4 }
 0x1d6   : > { %1543 = vst [vmem:[%s2229_s10 + $0x58] sm:$0xff] %v1521_v3  }
 0x1d7   : > { %1542 = vst [vmem:[%s2229_s10 + $0x50] sm:$0xff] %v1516_v6   ;;  %v1026_v10 = vadd.f32 %v1591_v60, %v1025_v7  ;;  %v1087_v11 = vadd.f32 %v1086_v5, %v1060_v8 }
 0x1d9   : > { %v1088_v13 = vadd.f32 %v1087_v11, %v1061_v9  ;;  %v1595_v14 = vpop.f32.mrb[8].mxu1  ;;  %v1027_v15 = vadd.f32 %v1592_v2, %v1026_v10 }
 0x1da   : > { %v850_v16 = vpop.f32.mrb[9].mxu1  ;;  %v1065_v27 = vmul.f32 %v1595_v14, %v1595_v14 }
 0x1db   : > { %v1028_v17 = vadd.f32 %v1027_v15, %v850_v16  ;;  %v1063_v18 = vmul.f32 %v850_v16, %v850_v16  ;;  %v1089_v19 = vadd.f32 %v1088_v13, %v1062_v12  ;;  %v1596_v20 = vpop.f32.mrb[10].mxu1 }
 0x1dc   : > { %v1531_v21 = vpack.c.bf16 %v1596_v20, %v1595_v14  ;;  %v853_v22 = vpop.f32.mrb[11].mxu1 }
 0x1dd   : > { %v1090_v23 = vadd.f32 %v1089_v19, %v1063_v18  ;;  %v1526_v24 = vpack.c.bf16 %v853_v22, %v850_v16  ;;  %v1029_v25 = vadd.f32 %v1028_v17, %v853_v22  ;;  %v1064_v26 = vmul.f32 %v853_v22, %v853_v22 }
 0x1de   : > { %1545 = vst [vmem:[%s2229_s10 + $0x68] sm:$0xff] %v1531_v21  }
 0x1df   : > { %1544 = vst [vmem:[%s2229_s10 + $0x60] sm:$0xff] %v1526_v24   ;;  %v1030_v28 = vadd.f32 %v1595_v14, %v1029_v25  ;;  %v1091_v29 = vadd.f32 %v1090_v23, %v1064_v26 }
 0x1e0   : > { %1807 = shalt.err (!%p1804_p5)
}
 0x1e1   : > { %s1808_s7 = scalar_lea.hbm %s2248_s25, 1792  ;;  %s1812_s22 = scalar_lea.hbm %s2334_s2, 3584 }
 0x1e2   : > { %p1809_p9 = scmp.ne.s32.totalorder %s2248_s25, %s1808_s7  ;;  %p1813_p3 = scmp.lt.u32.totalorder %s2248_s25, %s2334_s2 }
 0x1e3   : > { %p1814_p7 = scmp.lt.u32.totalorder %s1812_s22, %s1808_s7  ;;  %p1816_p4 = scmp.lt.u32.totalorder %s1808_s7, %s2248_s25 }
 0x1e4   : > { %p1810_p1 = pnand %p1809_p9, %p2043_p10 }
 0x1e5   : > { %p1815_p13 = por %p1814_p7, %p1813_p3 }
 0x1e6   : > { %p1811_p2 = pneg %p1810_p1 }
 0x1e7   : > { %p1817_p6 = por %p1816_p4, %p1815_p13 }
 0x1e9   : > { %p1818_p8 = pnand %p1817_p6, %p1811_p2 }
 0x1eb   : > { %1821 = shalt.err (!%p1818_p8)
}
 0x1ec   : > { %s1921_s11 = smov 64   ;;  %s1922_s18 = smov 4   ;;  %v1066_v30 = vmul.f32 %v1596_v20, %v1596_v20  ;;  %v1031_v31 = vadd.f32 %v1596_v20, %v1030_v28  ;;  %v1092_v32 = vadd.f32 %v1091_v29, %v1065_v27 }
 0x1ed   : > { %1613 = dma.vmem_to_hbm [thread:$0]  (%p2043_p10), %s2250_s9, 1792, %s2248_s25, %s1102_s26, %s1921_s11, %s1921_s11, %s1922_s18  }
 0x1ee   : > { %v1032_v33 = vrot.slane %v1031_v31, 4  ;;  %v1093_v34 = vadd.f32 %v1092_v32, %v1066_v30  ;;  %s1285_s19 = sshll.u32 %s2102_s30, 1  ;;  %s1431_s21 = sshll.u32 %s1904_s15, 5 }
 0x1ef   : > { %s230_s4 = scalar_lea.vmem [#allocation8], %s1285_s19  ;;  %s2283_s26 = scalar_lea.hbm %s2335_s3, %s1431_s21 }
 0x1f0   : > { %v1033_v35 = vadd.f32 %v1032_v33, %v1031_v31  ;;  %v1094_v36 = vrot.slane %v1093_v34, 4  ;;  %s1140_s6 = sshll.u32 %s230_s4, 4  ;;  %s1107_s29 = scalar_lea.sflag [#allocation9], %s2102_s30  ;;  %s2285_s6 = int_to_ptr.vmem [resolvable:$true] %s1140_s6 }
 0x1f1   : > { %s1822_s7 = scalar_lea.vmem %s2285_s6, 32  ;;  %s1923_s15 = smov [#allocation8]  }
 0x1f2   : > { %v1034_v37 = vrot.slane %v1033_v35, 2  ;;  %v1095_v38 = vadd.f32 %v1094_v36, %v1093_v34  ;;  %p1823_p12 = scmp.ne.s32.totalorder %s2285_s6, %s1822_s7  ;;  %s1826_s8 = sshll.u32 %s1923_s15, 4  ;;  %s1827_s8 = int_to_ptr.vmem [resolvable:$false] %s1826_s8 }
 0x1f3   : > { %s1828_s24 = scalar_lea.vmem %s1827_s8, 64  ;;  %p1829_p5 = scmp.lt.s32.totalorder %s2285_s6, %s1827_s8 }
 0x1f4   : > { %v1035_v39 = vadd.f32 %v1034_v37, %v1033_v35  ;;  %v1096_v40 = vrot.slane %v1095_v38, 2  ;;  %p1824_p11 = pnand %p1823_p12, %p2043_p10  ;;  %p1830_p9 = scmp.lt.s32.totalorder %s1828_s24, %s1822_s7 }
 0x1f6   : > { %v1036_v41 = vrot.slane %v1035_v39, 1  ;;  %v1097_v42 = vadd.f32 %v1096_v40, %v1095_v38  ;;  %p1825_p0 = pneg %p1824_p11  ;;  %p1831_p1 = por %p1830_p9, %p1829_p5 }
 0x1f8   : > { %v1037_v43 = vadd.f32 %v1036_v41, %v1035_v39  ;;  %v1098_v44 = vrot.slane %v1097_v42, 1  ;;  %p1832_p2 = pnand %p1831_p1, %p1825_p0 }
 0x1fa   : > { %1038 = vst [vmem:[%s230_s4] sm:$0x1] %v1037_v43  ;;  %v1099_v45 = vadd.f32 %v1098_v44, %v1097_v42 }
 0x1fc   : > { %1100 = vst [vmem:[%s230_s4 + $0x1] sm:$0x1] %v1099_v45 }
 0x1fd   : > { %1835 = shalt.err (!%p1832_p2)
}
 0x1fe   : > { %s1836_s30 = scalar_lea.hbm %s2283_s26, 32  ;;  %s1840_s10 = scalar_lea.hbm %s2335_s3, 64 }
 0x1ff   : > { %p1837_p3 = scmp.ne.s32.totalorder %s2283_s26, %s1836_s30  ;;  %p1841_p4 = scmp.lt.u32.totalorder %s2283_s26, %s2335_s3 }
 0x200   : > { %p1842_p6 = scmp.lt.u32.totalorder %s1840_s10, %s1836_s30  ;;  %p1844_p12 = scmp.lt.u32.totalorder %s1836_s30, %s2283_s26 }
 0x201   : > { %p1838_p7 = pnand %p1837_p3, %p2043_p10 }
 0x202   : > { %p1843_p8 = por %p1842_p6, %p1841_p4 }
 0x203   : > { %p1839_p13 = pneg %p1838_p7 }
 0x204   : > { %p1845_p11 = por %p1844_p12, %p1843_p8 }
 0x206   : > { %p1846_p0 = pnand %p1845_p11, %p1839_p13 }
 0x208   : > { %1849 = shalt.err (!%p1846_p0)
}
 0x209   : > { %1614 = dma.vmem_to_hbm [thread:$0]  (%p2043_p10), %s2285_s6, 32, %s2283_s26, %s1107_s29  }
 0x20a PF: > { %s1152_s19 = sand.u32 1, %s1892_s12   ;;  %p2353_p5 = scmp.ne.s32.totalorder %s2343_s23, 0 }
 0x20b   : > { %p2354_p9 = scmp.ge.s32.totalorder %s1912_s17, 2  ;;  %s1153_s21 = scalar_lea.sflag [#allocation4], %s1152_s19 }
 0x20d   : > { %p1626_p1 = pnand %p2354_p9, %p2353_p5 }
 0x20f   : > { %1883 = dma.done.wait (!%p1626_p1), %s1153_s21, 1792  }
 0x210   : > { %1885 = vsyncadd (!%p1626_p1), %s1153_s21, 4294965504  ;;  %s1162_s4 = scalar_lea.sflag [#allocation9], %s1152_s19 }
 0x211   : > { %1887 = dma.done.wait (!%p1626_p1), %s1162_s4, 32  }
 0x212   : > { %1889 = vsyncadd (!%p1626_p1), %s1162_s4, 4294967264  ;;  %s24_s17 = sadd.s32 1, %s1912_s17   ;;  %s2355_s12 = smov %s1896_s13 }
 0x213   : > { %p21_p2 = scmp.ge.s32.totalorder %s24_s17, 4   ;;  %s2356_s13 = smov %s1900_s14 }
 0x214   : > { %s2357_s14 = smov %s2052_s5  ;;  %s2358_s15 = smov %s1908_s16 }
 0x215   : > { %s2359_s16 = smov %s2361_s28  ;;  %23 = sbr.rel (!%p21_p2) target bundleno = 9 (0x9), region = 97 }
 0x21c   :  { %1167 = vsyncpa [#allocation3], 1 }
 0x21d   :  { %1169 = vsyncpa [#allocation3 + $0x1], 1 }
 0x21e   :  { %1170 = vsyncpa [#allocation6], 1 }
 0x21f   :  { %1171 = vsyncpa [#allocation4], 1 }
 0x220   :  { %1173 = vsyncpa [#allocation4 + $0x1], 1 }
 0x221   :  { %1174 = vsyncpa [#allocation9], 1 }
 0x222   :  { %1176 = vsyncpa [#allocation9 + $0x1], 1 }

</bundles_post_ra>
